<compile_context>
chip_gen: v7x
topology: tpu7x:2x2x1
jax: 0.10.0
libtpu: 0.0.40
codegen_flags: <defaults>
</compile_context>

<pallas_src>
import jax
import jax.numpy as jnp
from jax.experimental import pallas as pl
from jax.experimental.pallas import tpu as pltpu

_MiB = 1024 * 1024


def _abs_kernel(x_ref, o_ref):
    # 1 VPU op/element; the binding resource is HBM/DMA, so keep the body trivial.
    o_ref[...] = jnp.abs(x_ref[...])


def _sublane(itemsize):
    # Native packing tile heights: 4-byte -> 8, 2-byte -> 16, 1-byte -> 32.
    return {4: 8, 2: 16, 1: 32}.get(itemsize, 8)


def _tpu_generation():
    try:
        kind = jax.devices()[0].device_kind.lower()
    except Exception:
        return None
    for gen in (7, 6, 5):
        if f"v{gen}" in kind:
            return gen
    return None


def _block_budget():
    """(block_bytes, vmem_limit_bytes) per TPU generation."""
    gen = _tpu_generation()
    if gen == 7:      # 3.2 TB/s HBM per TC: big blocks to amortize per-step overhead
        block = 6 * _MiB
    elif gen == 6:    # measured mem-bound roofline knee is ~1-4 MiB on v6e
        block = 4 * _MiB
    else:             # v5e (16 MiB scoped default) / unknown: stay conservative
        block = 2 * _MiB
    # in + out, double-buffered = 4x block; add headroom for compiler scratch.
    vmem_limit = 4 * block + 16 * _MiB if gen is not None else None
    return block, vmem_limit


def _pick_cols(n):
    # Widest power-of-two lane multiple (<= 4096) that exactly divides n, so the
    # aligned path needs no padding/copies (reshape of a contiguous array is free).
    for cols in (4096, 2048, 1024, 512, 256, 128):
        if n % cols == 0:
            return cols
    return None


def _choose_block_rows(rows, cols, itemsize, sub, block_bytes):
    """Sublane-aligned block row count that (a) fits the block byte budget,
    (b) yields >=2 grid steps (>=4/8 for larger arrays) so both v7x TensorCores
    and the DMA pipeline have work, (c) prefers an exact divisor of `rows` so the
    final step isn't a masked partial store."""
    if rows <= sub:
        return rows  # full row extent: always layout-legal (tiny array)
    row_bytes = cols * itemsize
    max_br = max(sub, (block_bytes // row_bytes) // sub * sub)
    total_bytes = rows * row_bytes
    if total_bytes >= 16 * block_bytes:
        min_steps = 8
    elif total_bytes >= 4 * block_bytes:
        min_steps = 4
    else:
        min_steps = 2
    cap = max(sub, (rows // min_steps) // sub * sub)
    br = min(max_br, cap)
    # Bias toward an exact divisor of rows (search a few sublane multiples below br).
    for cand in range(br, max(sub, br - 8 * sub) - 1, -sub):
        if rows % cand == 0:
            return cand
    return br


@jax.jit
def pallas_abs(x):
    """Elementwise absolute value via a Pallas TPU kernel."""
    orig_shape = x.shape
    dtype = x.dtype
    n = x.size
    itemsize = jnp.dtype(dtype).itemsize
    if n == 0:
        return x
    if jnp.issubdtype(dtype, jnp.complexfloating) or itemsize > 4:
        # complex abs changes dtype; 64-bit dtypes are emulated on TPU.
        return jnp.abs(x)

    block_bytes, vmem_limit = _block_budget()
    sub = _sublane(itemsize)
    compiler_params = pltpu.CompilerParams(
        dimension_semantics=("parallel",),  # shard grid steps over v7x's two TCs
        vmem_limit_bytes=vmem_limit,
    )
    cost = pl.CostEstimate(flops=n, transcendentals=0, bytes_accessed=2 * n * itemsize)

    flat = x.reshape(-1)
    cols = _pick_cols(n)

    if cols is not None:
        # Aligned path: lane-dense 2-D view, 1-D grid over sublane-aligned row blocks.
        rows = n // cols
        x2d = flat.reshape(rows, cols)
        block_rows = _choose_block_rows(rows, cols, itemsize, sub, block_bytes)
        out2d = pl.pallas_call(
            _abs_kernel,
            out_shape=jax.ShapeDtypeStruct((rows, cols), dtype),
            grid_spec=pltpu.PrefetchScalarGridSpec(
                num_scalar_prefetch=0,
                grid=(pl.cdiv(rows, block_rows),),
                in_specs=[pl.BlockSpec((block_rows, cols), lambda i: (i, 0))],
                out_specs=pl.BlockSpec((block_rows, cols), lambda i: (i, 0)),
            ),
            compiler_params=compiler_params,
            cost_estimate=cost,
        )(x2d)
        return out2d.reshape(orig_shape)

    # Ragged path (n not a multiple of 128): flat 1-D cdiv grid, no pad / no slice;
    # Pallas masks the tail block so HBM traffic is a single read+write pass.
    chunk = sub * 128  # one packed (sublane, lane) tile worth of elements
    block = max(chunk, (block_bytes // itemsize) // chunk * chunk)
    if n <= block:
        block = n  # full-extent 1-D block: always layout-legal
    out_flat = pl.pallas_call(
        _abs_kernel,
        out_shape=jax.ShapeDtypeStruct((n,), dtype),
        grid_spec=pltpu.PrefetchScalarGridSpec(
            num_scalar_prefetch=0,
            grid=(pl.cdiv(n, block),),
            in_specs=[pl.BlockSpec((block,), lambda i: (i,))],
            out_specs=pl.BlockSpec((block,), lambda i: (i,)),
        ),
        compiler_params=compiler_params,
        cost_estimate=cost,
    )(flat)
    return out_flat.reshape(orig_shape)


if __name__ == "__main__":
    key = jax.random.PRNGKey(0)
    k0, k1, k2 = jax.random.split(key, 3)

    # NCHW-style small input, consistent with a generic elementwise module.
    x = jax.random.normal(k0, (2, 4, 16, 16), dtype=jnp.float32)
    y = pallas_abs(x)
    jax.block_until_ready(y)
    assert y.shape == x.shape and y.dtype == x.dtype
    assert jnp.array_equal(y, jnp.abs(x)), "mismatch vs jnp.abs reference (aligned path)"

    # Ragged size (105 elements, not a multiple of 128) exercises the no-pad 1-D path.
    xr = jax.random.normal(k1, (7, 15), dtype=jnp.float32)
    yr = pallas_abs(xr)
    jax.block_until_ready(yr)
    assert jnp.array_equal(yr, jnp.abs(xr)), "mismatch vs jnp.abs reference (ragged path)"

    # bf16 coverage (sublane packing = 16).
    xb = jax.random.normal(k2, (2, 4, 16, 16), dtype=jnp.float32).astype(jnp.bfloat16)
    yb = pallas_abs(xb)
    jax.block_until_ready(yb)
    assert jnp.array_equal(yb, jnp.abs(xb)), "mismatch vs jnp.abs reference (bf16)"

    print("KERNEL_OK")
</pallas_src>

<mosaic_0001>
module attributes {stable_mosaic.version = 11 : i64} {
  func.func @_abs_kernel(%arg0: i32, %arg1: memref<1x2048xf32, #tpu.memory_space<vmem>>, %arg2: memref<1x2048xf32, #tpu.memory_space<vmem>>) attributes {dimension_semantics = [#tpu.dimension_semantics<parallel>], iteration_bounds = array<i64: 1>, scalar_prefetch = 0 : i64, scratch_operands = 0 : i64, tpu.core_type = #tpu.core_type<tc>, window_params = [{transform_indices = @transform_0, window_bounds = array<i64: 1, 2048>}, {transform_indices = @transform_1, window_bounds = array<i64: 1, 2048>}]} {
    %c0 = arith.constant 0 : index
    %c0_0 = arith.constant 0 : index
    %0 = vector.load %arg1[%c0, %c0_0] : memref<1x2048xf32, #tpu.memory_space<vmem>>, vector<1x2048xf32>
    %1 = math.absf %0 : vector<1x2048xf32>
    %c0_1 = arith.constant 0 : index
    %c0_2 = arith.constant 0 : index
    %2 = vector.load %arg2[%c0_1, %c0_2] : memref<1x2048xf32, #tpu.memory_space<vmem>>, vector<1x2048xf32>
    tpu.vector_store %arg2[%c0_1, %c0_2], %1 {strides = array<i32>} : memref<1x2048xf32, #tpu.memory_space<vmem>>, vector<1x2048xf32>,
    return
  }
  func.func @transform_0(%arg0: i32) -> (i32, i32) {
    %c0_i32 = arith.constant 0 : i32
    %c0_i32_0 = arith.constant 0 : i32
    return %arg0, %c0_i32 : i32, i32
  }
  func.func @transform_1(%arg0: i32) -> (i32, i32) {
    %c0_i32 = arith.constant 0 : i32
    %c0_i32_0 = arith.constant 0 : i32
    return %arg0, %c0_i32 : i32, i32
  }
}

</mosaic_0001>

<bundles_post_ra>
// kernel: pallas_abs.1
= control target key start
LH: loop header
LB: loop body
LE: loop exit
PB: predicated region body
PF: predicated region fallthrough
CT: control target
= control target key end

     0   :  { %s40_s0 = inlined_call_operand.vmem [shape: f32[1,2048], index: 0, kind: input, shape index: {}]   ;;  %s41_s1 = inlined_call_operand.vmem [shape: f32[1,2048], index: 1, kind: output, shape index: {}]  }
   0x1   :  { %v8_v0 = vld [vmem:[%s40_s0] sm:$0xff]  ;;  %v9_v1 = vld [vmem:[%s40_s0 + $0x8] sm:$0xff] }
   0x2   :  { %v10_v2 = vand.u32 2147483647, %v8_v0  ;;  %v11_v3 = vand.u32 2147483647, %v9_v1 }
   0x4   :  { %12 = vst [vmem:[%s41_s1] sm:$0xff] %v10_v2  ;;  %13 = vst [vmem:[%s41_s1 + $0x8] sm:$0xff] %v11_v3 }

</bundles_post_ra>
